<compile_context>
chip_gen: v6e
topology: v6e:2x2x1
jax: 0.10.0
libtpu: 0.0.40
codegen_flags: <defaults>
</compile_context>

<pallas_src>
import jax
import jax.numpy as jnp
from jax.experimental import pallas as pl
from jax.experimental.pallas import tpu as pltpu


def _make_outconv_kernel(cin, cout, use_mxu):
    def kernel(x_ref, w_ref, b_ref, o_ref):
        # x_ref: (1, Cin, T)   w_ref: (Cout, Cin)   b_ref: (Cout, 1)   o_ref: (1, Cout, T)
        x = x_ref[0].astype(jnp.float32)        # (Cin, T)
        w = w_ref[...].astype(jnp.float32)      # (Cout, Cin)
        b = b_ref[...].astype(jnp.float32)      # (Cout, 1)
        if use_mxu:
            acc = jnp.dot(w, x, preferred_element_type=jnp.float32)   # (Cout, T)
        else:
            # VPU path: Cin broadcast-FMAs over the lane-dense (Cout, T) tile.
            acc = w[:, 0:1] * x[0:1, :]
            for ci in range(1, cin):
                acc = acc + w[:, ci:ci + 1] * x[ci:ci + 1, :]
        o_ref[0] = (acc + b).astype(o_ref.dtype)

    return kernel


def outconv_pallas(x_nchw, weight, bias, *, thw=4096):
    """1x1 conv (OutConv). x_nchw: (N,Cin,H,W); weight: (Cout,Cin,1,1); bias: (Cout,)."""
    N, Cin, H, W = x_nchw.shape
    Cout = weight.shape[0]
    HW = H * W

    x3 = x_nchw.reshape(N, Cin, HW)             # free reshape, stays in NCHW order
    w_mat = weight.reshape(Cout, Cin)
    b_col = bias.reshape(Cout, 1)

    itemsize = jnp.dtype(x3.dtype).itemsize
    # Keep double-buffered input+output blocks well under scoped VMEM on all of
    # v5e / v6e / v7x (v7x has only 64 MiB physical VMEM per TensorCore).
    vmem_budget = 20 * 1024 * 1024
    max_tile_by_vmem = max(128, vmem_budget // (2 * (Cin + Cout) * itemsize))
    tile = min(thw, HW, max_tile_by_vmem)
    if tile < HW:
        tile = max(128, (tile // 128) * 128)    # lane-dense partial tiles
    num_tiles = pl.cdiv(HW, tile)
    HW_pad = num_tiles * tile
    if HW_pad != HW:
        # TODO(synk): the tail block could use a masked store instead of padding.
        x3 = jnp.pad(x3, ((0, 0), (0, 0), (0, HW_pad - HW)))

    kernel = _make_outconv_kernel(Cin, Cout, use_mxu=(Cin > 8 or Cout > 8))

    out3 = pl.pallas_call(
        kernel,
        out_shape=jax.ShapeDtypeStruct((N, Cout, HW_pad), x3.dtype),
        grid_spec=pltpu.PrefetchScalarGridSpec(
            num_scalar_prefetch=0,
            grid=(N, num_tiles),
            in_specs=[
                pl.BlockSpec((1, Cin, tile), lambda n, j: (n, 0, j)),
                pl.BlockSpec((Cout, Cin), lambda n, j: (0, 0)),
                pl.BlockSpec((Cout, 1), lambda n, j: (0, 0)),
            ],
            out_specs=pl.BlockSpec((1, Cout, tile), lambda n, j: (n, 0, j)),
        ),
        compiler_params=pltpu.CompilerParams(
            dimension_semantics=("parallel", "parallel"),   # both axes independent (v7x 2-TC)
            vmem_limit_bytes=32 * 1024 * 1024,
        ),
        cost_estimate=pl.CostEstimate(
            flops=2 * N * HW * Cin * Cout,
            transcendentals=0,
            bytes_accessed=itemsize * (N * Cin * HW + Cin * Cout + Cout + N * Cout * HW),
        ),
    )(x3, w_mat, b_col)

    if HW_pad != HW:
        out3 = out3[:, :, :HW]
    return out3.reshape(N, Cout, H, W)


def _reference(x, weight, bias):
    Cout, Cin = weight.shape[0], weight.shape[1]
    return (jnp.einsum("nchw,oc->nohw", x, weight.reshape(Cout, Cin))
            + bias[None, :, None, None])


if __name__ == "__main__":
    key = jax.random.PRNGKey(0)
    k_x, k_w, k_b, k_x2, k_w2, k_b2 = jax.random.split(key, 6)

    # Primary case (matches the UNet OutConv usage shape-wise): small channels -> VPU path.
    N, Cin, Cout, Hdim, Wdim = 2, 4, 3, 16, 16
    x = jax.random.normal(k_x, (N, Cin, Hdim, Wdim), dtype=jnp.float32)
    bound = 1.0 / (Cin ** 0.5)
    weight = jax.random.uniform(k_w, (Cout, Cin, 1, 1), jnp.float32, -bound, bound)
    bias = jax.random.uniform(k_b, (Cout,), jnp.float32, -bound, bound)

    y = outconv_pallas(x, weight, bias)
    jax.block_until_ready(y)
    assert y.shape == (N, Cout, Hdim, Wdim)
    assert jnp.allclose(y, _reference(x, weight, bias), atol=1e-5, rtol=1e-5)

    # Secondary case: larger channels -> MXU path (also exercises tiling logic).
    N2, Cin2, Cout2, H2, W2 = 1, 32, 16, 16, 16
    x2 = jax.random.normal(k_x2, (N2, Cin2, H2, W2), dtype=jnp.float32)
    bound2 = 1.0 / (Cin2 ** 0.5)
    weight2 = jax.random.uniform(k_w2, (Cout2, Cin2, 1, 1), jnp.float32, -bound2, bound2)
    bias2 = jax.random.uniform(k_b2, (Cout2,), jnp.float32, -bound2, bound2)

    y2 = outconv_pallas(x2, weight2, bias2)
    jax.block_until_ready(y2)
    assert y2.shape == (N2, Cout2, H2, W2)
    assert jnp.allclose(y2, _reference(x2, weight2, bias2), atol=1e-4, rtol=1e-4)

    print("KERNEL_OK")
</pallas_src>

<mosaic_0001>
module attributes {stable_mosaic.version = 11 : i64} {
  func.func @kernel(%arg0: i32, %arg1: i32, %arg2: memref<1x4x256xf32, #tpu.memory_space<vmem>>, %arg3: memref<3x4xf32, #tpu.memory_space<vmem>>, %arg4: memref<3x1xf32, #tpu.memory_space<vmem>>, %arg5: memref<1x3x256xf32, #tpu.memory_space<vmem>>) attributes {dimension_semantics = [#tpu.dimension_semantics<parallel>, #tpu.dimension_semantics<parallel>], iteration_bounds = array<i64: 2, 1>, scalar_prefetch = 0 : i64, scratch_operands = 0 : i64, tpu.core_type = #tpu.core_type<tc>, window_params = [{transform_indices = @transform_0, window_bounds = array<i64: 1, 4, 256>}, {pipeline_mode = #tpu.pipeline_mode<synchronous>, transform_indices = @transform_1, window_bounds = array<i64: 3, 4>}, {pipeline_mode = #tpu.pipeline_mode<synchronous>, transform_indices = @transform_2, window_bounds = array<i64: 3, 1>}, {transform_indices = @transform_3, window_bounds = array<i64: 1, 3, 256>}]} {
    %c0 = arith.constant 0 : index
    %c0_0 = arith.constant 0 : index
    %c0_1 = arith.constant 0 : index
    %0 = vector.load %arg2[%c0, %c0_0, %c0_1] : memref<1x4x256xf32, #tpu.memory_space<vmem>>, vector<1x4x256xf32>
    %1 = vector.shape_cast %0 : vector<1x4x256xf32> to vector<4x256xf32>
    %c0_2 = arith.constant 0 : index
    %c0_3 = arith.constant 0 : index
    %2 = vector.load %arg3[%c0_2, %c0_3] : memref<3x4xf32, #tpu.memory_space<vmem>>, vector<3x4xf32>
    %c0_4 = arith.constant 0 : index
    %c0_5 = arith.constant 0 : index
    %3 = vector.load %arg4[%c0_4, %c0_5] : memref<3x1xf32, #tpu.memory_space<vmem>>, vector<3x1xf32>
    %4 = vector.extract_strided_slice %2 {offsets = [0, 0], sizes = [3, 1], strides = [1, 1]} : vector<3x4xf32> to vector<3x1xf32>
    %5 = vector.extract_strided_slice %1 {offsets = [0, 0], sizes = [1, 256], strides = [1, 1]} : vector<4x256xf32> to vector<1x256xf32>
    %6 = vector.broadcast %4 : vector<3x1xf32> to vector<3x256xf32>
    %7 = vector.broadcast %5 : vector<1x256xf32> to vector<3x256xf32>
    %8 = arith.mulf %6, %7 : vector<3x256xf32>
    %9 = vector.extract_strided_slice %2 {offsets = [0, 1], sizes = [3, 1], strides = [1, 1]} : vector<3x4xf32> to vector<3x1xf32>
    %10 = vector.extract_strided_slice %1 {offsets = [1, 0], sizes = [1, 256], strides = [1, 1]} : vector<4x256xf32> to vector<1x256xf32>
    %11 = vector.broadcast %9 : vector<3x1xf32> to vector<3x256xf32>
    %12 = vector.broadcast %10 : vector<1x256xf32> to vector<3x256xf32>
    %13 = arith.mulf %11, %12 : vector<3x256xf32>
    %14 = arith.addf %8, %13 : vector<3x256xf32>
    %15 = vector.extract_strided_slice %2 {offsets = [0, 2], sizes = [3, 1], strides = [1, 1]} : vector<3x4xf32> to vector<3x1xf32>
    %16 = vector.extract_strided_slice %1 {offsets = [2, 0], sizes = [1, 256], strides = [1, 1]} : vector<4x256xf32> to vector<1x256xf32>
    %17 = vector.broadcast %15 : vector<3x1xf32> to vector<3x256xf32>
    %18 = vector.broadcast %16 : vector<1x256xf32> to vector<3x256xf32>
    %19 = arith.mulf %17, %18 : vector<3x256xf32>
    %20 = arith.addf %14, %19 : vector<3x256xf32>
    %21 = vector.extract_strided_slice %2 {offsets = [0, 3], sizes = [3, 1], strides = [1, 1]} : vector<3x4xf32> to vector<3x1xf32>
    %22 = vector.extract_strided_slice %1 {offsets = [3, 0], sizes = [1, 256], strides = [1, 1]} : vector<4x256xf32> to vector<1x256xf32>
    %23 = vector.broadcast %21 : vector<3x1xf32> to vector<3x256xf32>
    %24 = vector.broadcast %22 : vector<1x256xf32> to vector<3x256xf32>
    %25 = arith.mulf %23, %24 : vector<3x256xf32>
    %26 = arith.addf %20, %25 : vector<3x256xf32>
    %27 = vector.broadcast %3 : vector<3x1xf32> to vector<3x256xf32>
    %28 = arith.addf %26, %27 : vector<3x256xf32>
    %c0_6 = arith.constant 0 : index
    %c0_7 = arith.constant 0 : index
    %c0_8 = arith.constant 0 : index
    %29 = vector.load %arg5[%c0_6, %c0_7, %c0_8] : memref<1x3x256xf32, #tpu.memory_space<vmem>>, vector<1x3x256xf32>
    %30 = vector.shape_cast %29 : vector<1x3x256xf32> to vector<3x256xf32>
    %31 = vector.shape_cast %28 : vector<3x256xf32> to vector<1x3x256xf32>
    tpu.vector_store %arg5[%c0_6, %c0_7, %c0_8], %31 {strides = array<i32>} : memref<1x3x256xf32, #tpu.memory_space<vmem>>, vector<1x3x256xf32>,
    return
  }
  func.func @transform_0(%arg0: i32, %arg1: i32) -> (i32, i32, i32) {
    %c0_i32 = arith.constant 0 : i32
    %c0_i32_0 = arith.constant 0 : i32
    return %arg0, %c0_i32, %arg1 : i32, i32, i32
  }
  func.func @transform_1(%arg0: i32, %arg1: i32) -> (i32, i32) {
    %c0_i32 = arith.constant 0 : i32
    %c0_i32_0 = arith.constant 0 : i32
    %c0_i32_1 = arith.constant 0 : i32
    return %c0_i32, %c0_i32_0 : i32, i32
  }
  func.func @transform_2(%arg0: i32, %arg1: i32) -> (i32, i32) {
    %c0_i32 = arith.constant 0 : i32
    %c0_i32_0 = arith.constant 0 : i32
    %c0_i32_1 = arith.constant 0 : i32
    return %c0_i32, %c0_i32_0 : i32, i32
  }
  func.func @transform_3(%arg0: i32, %arg1: i32) -> (i32, i32, i32) {
    %c0_i32 = arith.constant 0 : i32
    %c0_i32_0 = arith.constant 0 : i32
    return %arg0, %c0_i32, %arg1 : i32, i32, i32
  }
}

</mosaic_0001>

<bundles_post_ra>
// kernel: tpu_custom_call.1
= control target key start
LH: loop header
LB: loop body
LE: loop exit
PB: predicated region body
PF: predicated region fallthrough
CT: control target
= control target key end

     0   :  { %8 = vsyncpa [#allocation3], 0  ;;  %s722_s0 = inlined_call_operand.hbm [shape: f32[2,4,256], index: 0, kind: input, shape index: {}]   ;;  %s723_s1 = inlined_call_operand.vmem [shape: f32[3,4], index: 1, kind: input, shape index: {}]   ;;  %s724_s2 = inlined_call_operand.vmem [shape: f32[3,1], index: 2, kind: input, shape index: {}]   ;;  %s725_s3 = inlined_call_operand.vmem [shape: f32[2,3,256], index: 3, kind: output, shape index: {}]  }
   0x1   :  { %10 = vsyncpa [#allocation3 + $0x1], 0  ;;  %s616_s12 = smov 0   ;;  %s618_s13 = smov 0  }
   0x2   :  { %s620_s14 = smov 0   ;;  %s622_s15 = smov 0  }
   0x3   :  { %s624_s16 = smov 0   ;;  %s626_s17 = smov 0  }
   0x4 LB: > { %s431_s18 = sadd.s32 4294967295, %s589_s17   ;;  %s28_s19 = sadd.s32 1, %s585_s16  ;;  %s589_s17 = sphi %s626_s17, %s16_s17   ;;  %s585_s16 = sphi %s624_s16, %s733_s16   ;;  %s581_s15 = sphi %s622_s15, %s732_s15   ;;  %s577_s14 = sphi %s620_s14, %s731_s14   ;;  %s573_s13 = sphi %s618_s13, %s730_s13   ;;  %s569_s12 = sphi %s616_s12, %s729_s12  }
   0x5   : > { %p30_p0 = scmp.ge.s32.totalorder %s28_s19, 2  ;;  %s37_s20 = sadd.s32 1, %s577_s14 }
   0x6   : > { %p44_p1 = scmp.ne.s32.totalorder %s577_s14, %s573_s13  ;;  %p45_p2 = scmp.eq.s32.totalorder %s589_s17, 0 }
   0x7   : > { %s735_s19 = smov (%p30_p0, %s28_s19), 0  ;;  %p50_p4 = scmp.ne.s32.totalorder %s573_s13, %s569_s12 }
   0x8   : > { %p652_p3 = por %p45_p2, %p44_p1  ;;  %s32_s22 = ssub.s32 %s585_s16, %s735_s19 }
   0x9   : > { %p51_p5 = scmp.eq.s32.totalorder %s431_s18, 0  ;;  %p35_p6 = scmp.eq.s32.totalorder %s32_s22, 0 }
   0xa   : > { %p452_p8 = scmp.lt.s32.totalorder %s589_s17, 2  ;;  %s150_s25 = sand.u32 1, %s577_s14  }
   0xb   : > { %p659_p7 = por %p51_p5, %p50_p4  ;;  %s444_s26 = sshll.u32 %s585_s16, 7 }
   0xc   : > { %s665_s24 = scalar_select %p35_p6, %s577_s14, %s37_s20  }
   0xd   : > { %s435_s27 = sshll.u32 %s150_s25, 3  ;;  %s162_s30 = scalar_lea.hbm %s722_s0, %s444_s26 }
   0xe   : > { %s154_s4 = scalar_lea.vmem [#allocation2], %s435_s27  ;;  %p674_p9 = pnand %p452_p8, %p652_p3 }
   0xf   : > { %s164_s5 = sshll.u32 %s154_s4, 4  ;;  %p438_p10 = scmp.ge.s32.totalorder %s589_s17, 1  ;;  %s165_s5 = int_to_ptr.vmem [resolvable:$true] %s164_s5 }
  0x10   : > { %p169_p11 = scmp.lt.s32.totalorder %s589_s17, 3  ;;  %s151_s7 = scalar_lea.sflag [#allocation3], %s150_s25 }
  0x11   : > { %p513_p12 = pneg %p674_p9  ;;  %s524_s8 = scalar_lea.vmem %s165_s5, 128 }
  0x12   : > { %p525_p13 = scmp.ne.s32.totalorder %s165_s5, %s524_s8  ;;  %s591_s9 = smov [#allocation2]  }
  0x13   : > { %s529_s10 = sshll.u32 %s591_s9, 4  ;;  %s530_s10 = int_to_ptr.vmem [resolvable:$false] %s529_s10 }
  0x14   : > { %p527_p0 = pnand %p525_p13, %p513_p12  ;;  %s531_s11 = scalar_lea.vmem %s530_s10, 256 }
  0x15   : > { %p532_p2 = scmp.lt.s32.totalorder %s165_s5, %s530_s10  ;;  %p533_p3 = scmp.lt.s32.totalorder %s531_s11, %s524_s8 }
  0x16   : > { %p528_p1 = pneg %p527_p0 }
  0x17   : > { %p534_p4 = por %p533_p3, %p532_p2 }
  0x19   : > { %p535_p5 = pnand %p534_p4, %p528_p1 }
  0x1b   : > { %538 = shalt.err (!%p535_p5)
}
  0x1c   : > { %451 = dma.hbm_to_vmem [thread:$0]  (!%p674_p9), %s162_s30, 128, %s165_s5, %s151_s7  }
  0x1d   : > { %p170_p6 = pnand %p438_p10, %p169_p11 }
  0x1e   : > { %s175_s12 = sand.u32 (!%p170_p6), 1, %s573_s13  }
  0x1f   : > { %173 = sbr.rel (%p170_p6) target bundleno = 181 (0xb5), region = 32  ;;  %s439_s18 = sshll.u32 (!%p170_p6), %s175_s12, 3 }
  0x20   : > { %s176_s20 = scalar_lea.sflag (!%p170_p6), [#allocation3], %s175_s12  ;;  %s179_s21 = scalar_lea.vmem (!%p170_p6), [#allocation2], %s439_s18 }
  0x24   : > { %564 = dma.done.wait (%p659_p7), %s176_s20, 128  }
  0x25   : > { %566 = vsyncadd (%p659_p7), %s176_s20, 4294967168  ;;  %v592_v0 = vmov 0   ;;  %v593_v1 = vmov 2   ;;  %v218_v2 = vld [vmem:[%s723_s1] sm:$0x7]  ;;  %v594_v3 = vmov 1   ;;  %v226_v6 = vlaneseq }
  0x26   : > { %505 = vset.pattern.permute.xlu0 %v592_v0  ;;  %507 = vset.pattern.permute.xlu1 %v593_v1  ;;  %v595_v4 = vmov 3   ;;  %v219_v5 = vld [vmem:[%s724_s2] sm:$0x7]  ;;  %p208_p7 = scmp.lt.s32.totalorder %s581_s15, 1 }
  0x27   : > { %222 = vperm.xlu0 %505, %v218_v2   ;;  %273 = vperm.xlu1 %507, %v218_v2   ;;  %v227_v7 = vshrl.u32 %v226_v6, 7  ;;  %v217_v12 = vld [vmem:[%s179_s21] sm:$0xff] }
  0x28   : > { %s737_s15 = smov (!%p208_p7, %s581_s15), 1 }
  0x29   : > { %v228_v8 = vsub.s32 0, %v227_v7  ;;  %v232_v9 = vsub.s32 4, %v227_v7  ;;  %v252_v10 = vsub.s32 1, %v227_v7  ;;  %v256_v11 = vsub.s32 5, %v227_v7  ;;  %s445_s23 = sshll.u32 %s737_s15, 3 }
  0x2a   : > { %v278_v13 = vsub.s32 2, %v227_v7  ;;  %v282_v14 = vsub.s32 6, %v227_v7  ;;  %v304_v15 = vsub.s32 3, %v227_v7  ;;  %v308_v16 = vsub.s32 7, %v227_v7  ;;  %s215_s30 = scalar_lea.vmem %s725_s3, %s445_s23 }
  0x2b   : > { %506 = vset.pattern.permute.xlu0 %v594_v3  ;;  %508 = vset.pattern.permute.xlu1 %v595_v4  ;;  %v229_v17 = vrot.slane %v217_v12, %v228_v8  ;;  %v233_v18 = vrot.slane %v217_v12, %v232_v9  ;;  %v253_v19 = vrot.slane %v217_v12, %v252_v10 }
  0x2c   : > { %247 = vperm.xlu0 %506, %v218_v2   ;;  %299 = vperm.xlu1 %508, %v218_v2   ;;  %v257_v20 = vrot.slane %v217_v12, %v256_v11  ;;  %v279_v21 = vrot.slane %v217_v12, %v278_v13  ;;  %v283_v22 = vrot.slane %v217_v12, %v282_v14 }
  0x2d   : > { %v305_v25 = vrot.slane %v217_v12, %v304_v15  ;;  %v309_v26 = vrot.slane %v217_v12, %v308_v16  ;;  %v239_v27 = vrot.slane %v229_v17, %v228_v8  ;;  %v243_v28 = vrot.slane %v233_v18, %v228_v8 }
  0x2e   : > { %v263_v29 = vrot.slane %v253_v19, %v252_v10  ;;  %v267_v30 = vrot.slane %v257_v20, %v252_v10  ;;  %v289_v31 = vrot.slane %v279_v21, %v278_v13  ;;  %v293_v32 = vrot.slane %v283_v22, %v278_v13 }
  0x2f   : > { %v315_v33 = vrot.slane %v305_v25, %v304_v15  ;;  %v319_v34 = vrot.slane %v309_v26, %v304_v15 }
  0x30   : > { %509 = vset.pattern.permute.xlu1 %v592_v0  ;;  %510 = vset.pattern.permute.xlu0 %v592_v0 }
  0x31   : > { %326 = vperm.xlu1 %509, %v219_v5  }
  0xa2   : > { %v223_v23 = vpop.permute.xlu0 %222  ;;  %v274_v24 = vpop.permute.xlu1 %273 }
  0xa3   : > { %v244_v37 = vmul.f32 %v239_v27, %v223_v23  ;;  %v245_v38 = vmul.f32 %v243_v28, %v223_v23  ;;  %v294_v41 = vmul.f32 %v289_v31, %v274_v24  ;;  %v295_v42 = vmul.f32 %v293_v32, %v274_v24 }
  0xa7   : > { %v248_v35 = vpop.permute.xlu0 %247  ;;  %v300_v36 = vpop.permute.xlu1 %299 }
  0xa8   : > { %v268_v39 = vmul.f32 %v263_v29, %v248_v35  ;;  %v269_v40 = vmul.f32 %v267_v30, %v248_v35  ;;  %v320_v45 = vmul.f32 %v315_v33, %v300_v36  ;;  %v321_v46 = vmul.f32 %v319_v34, %v300_v36 }
  0xaa   : > { %v270_v43 = vadd.f32 %v268_v39, %v244_v37  ;;  %v271_v44 = vadd.f32 %v269_v40, %v245_v38 }
  0xac   : > { %v296_v47 = vadd.f32 %v294_v41, %v270_v43  ;;  %v297_v48 = vadd.f32 %v295_v42, %v271_v44  ;;  %v327_v49 = vpop.permute.xlu1 %326 }
  0xae   : > { %v322_v50 = vadd.f32 %v320_v45, %v296_v47  ;;  %v323_v51 = vadd.f32 %v321_v46, %v297_v48 }
  0xb0   : > { %v329_v52 = vadd.f32 %v327_v49, %v322_v50  ;;  %v330_v53 = vadd.f32 %v327_v49, %v323_v51 }
  0xb2   : > { %v333_v54 = vcombine.low %v329_v52, %v330_v53 }
  0xb4   : > { %335 = vst [vmem:[%s215_s30] sm:$0x77] %v333_v54 }
  0xb5 PF: > { %s16_s17 = sadd.s32 1, %s589_s17   ;;  %s729_s12 = smov %s573_s13 }
  0xb6   : > { %p13_p8 = scmp.ge.s32.totalorder %s16_s17, 4   ;;  %s730_s13 = smov %s577_s14 }
  0xb7   : > { %s731_s14 = smov %s665_s24  ;;  %s732_s15 = smov %s585_s16 }
  0xb8   : > { %s733_s16 = smov %s735_s19  ;;  %15 = sbr.rel (!%p13_p8) target bundleno = 4 (0x4), region = 72 }
  0xbd   :  { %366 = vsyncpa [#allocation3], 1 }
  0xbe   :  { %368 = vsyncpa [#allocation3 + $0x1], 1 }

</bundles_post_ra>
